<compile_context>
chip_gen: v7x
topology: tpu7x:2x2x1
jax: 0.10.0
libtpu: 0.0.40
codegen_flags: <defaults>
</compile_context>

<pallas_src>
import jax
import jax.numpy as jnp
from jax.experimental import pallas as pl
from jax.experimental.pallas import tpu as pltpu


# ---------------------------------------------------------------------------
# Fused HBM→HBM identity copy of a list of arrays (one DMA per array).
# ---------------------------------------------------------------------------
def _fused_dma_identity_copy(tensors):
    """Materialized copies of `tensors` via a single Pallas call.

    Every input/output lives in HBM (memory_space=pl.ANY); the kernel body
    only issues async copies.  All copies are started before any is waited on
    so the DMAs of different embeds overlap.
    """
    n = len(tensors)

    def kernel(*refs):
        in_refs = refs[:n]
        out_refs = refs[n:2 * n]
        sems = refs[2 * n]
        copies = [
            pltpu.make_async_copy(in_refs[i], out_refs[i], sems.at[i])
            for i in range(n)
        ]
        for cp in copies:          # fire all DMAs
            cp.start()
        for cp in copies:          # then drain
            cp.wait()

    total_bytes = sum(2 * int(t.size) * t.dtype.itemsize for t in tensors)

    outs = pl.pallas_call(
        kernel,
        out_shape=tuple(jax.ShapeDtypeStruct(t.shape, t.dtype) for t in tensors),
        in_specs=[pl.BlockSpec(memory_space=pl.ANY) for _ in range(n)],
        out_specs=tuple(pl.BlockSpec(memory_space=pl.ANY) for _ in range(n)),
        scratch_shapes=[pltpu.SemaphoreType.DMA((n,))],
        cost_estimate=pl.CostEstimate(
            flops=0, transcendentals=0, bytes_accessed=total_bytes),
    )(*tensors)
    return list(outs)


# ---------------------------------------------------------------------------
# Module wrapper.
# ---------------------------------------------------------------------------
class MultiIPAdapterIdentity:
    """JAX port of the PyTorch MultiIPAdapterIdentity module.

    forward(image_embeds): reshape each embed to
    (batch, num_image_text_embeds, -1).

    Default path is a pure metadata reshape (no data movement), matching
    torch's `.reshape` semantics.  Set `materialize=True` to force fresh
    output buffers via a single fused HBM→HBM DMA pallas_call.
    """

    def __init__(self, num_image_text_embeds: int, materialize: bool = False):
        self.num_image_text_embeds = num_image_text_embeds
        self.materialize = materialize

    def __call__(self, image_embeds):
        if len(image_embeds) == 0:
            raise ValueError("image_embeds must contain at least one tensor")
        batch_size = image_embeds[0].shape[0]
        # The reshape itself is free metadata — do it first, outside any kernel.
        reshaped = [
            jnp.reshape(ie, (batch_size, self.num_image_text_embeds, -1))
            for ie in image_embeds
        ]
        if not self.materialize:
            # Hot path: reshape only — no Pallas, no HBM traffic.
            return reshaped
        # Materialized path: one fused pallas_call, one HBM→HBM DMA per embed.
        # (For production use, tensors below ~1 MiB could skip the kernel
        #  entirely; kept unconditional here so the kernel is exercised.)
        return _fused_dma_identity_copy(reshaped)


# ---------------------------------------------------------------------------
# Demo / correctness check.
# ---------------------------------------------------------------------------
if __name__ == "__main__":
    key = jax.random.PRNGKey(0)
    k0, k1, k2 = jax.random.split(key, 3)

    batch = 2
    num_image_text_embeds = 4

    # Already-3D embed, flattened embed, and a wider embed.
    ie0 = jax.random.normal(
        k0, (batch, num_image_text_embeds, 32), dtype=jnp.float32)
    ie1 = jax.random.normal(
        k1, (batch, num_image_text_embeds * 64), dtype=jnp.float32)
    ie2 = jax.random.normal(
        k2, (batch, num_image_text_embeds, 640), dtype=jnp.float32)
    inputs = [ie0, ie1, ie2]

    # Recommended path: pure reshape, no kernel.
    module = MultiIPAdapterIdentity(num_image_text_embeds)
    outs = module(inputs)

    # Materialized path: fused HBM→HBM DMA copy kernel.
    module_mat = MultiIPAdapterIdentity(num_image_text_embeds, materialize=True)
    outs_mat = module_mat(inputs)

    outs = [jax.block_until_ready(o) for o in outs]
    outs_mat = [jax.block_until_ready(o) for o in outs_mat]

    refs = [jnp.reshape(ie, (batch, num_image_text_embeds, -1)) for ie in inputs]
    for o, om, r in zip(outs, outs_mat, refs):
        assert o.shape == r.shape, (o.shape, r.shape)
        assert om.shape == r.shape, (om.shape, r.shape)
        assert jnp.array_equal(o, r)
        assert jnp.array_equal(om, r)

    print("KERNEL_OK")
</pallas_src>

<mosaic_0001>
module attributes {stable_mosaic.version = 11 : i64} {
  func.func @kernel(%arg0: memref<2x4x32xf32, #tpu.memory_space<any>>, %arg1: memref<2x4x64xf32, #tpu.memory_space<any>>, %arg2: memref<2x4x640xf32, #tpu.memory_space<any>>, %arg3: memref<2x4x32xf32, #tpu.memory_space<any>>, %arg4: memref<2x4x64xf32, #tpu.memory_space<any>>, %arg5: memref<2x4x640xf32, #tpu.memory_space<any>>, %arg6: memref<3x!tpu.dma_semaphore, #tpu.memory_space<semaphore_mem>>) attributes {dimension_semantics = [], scalar_prefetch = 0 : i64, scratch_operands = 1 : i64, tpu.core_type = #tpu.core_type<tc>} {
    %c0_i32 = arith.constant 0 : i32
    %0 = tpu.memref_slice %arg6[%c0_i32] : memref<3x!tpu.dma_semaphore, #tpu.memory_space<semaphore_mem>> -> memref<1x!tpu.dma_semaphore, #tpu.memory_space<semaphore_mem>>
    %1 = tpu.memref_squeeze %0 : memref<1x!tpu.dma_semaphore, #tpu.memory_space<semaphore_mem>> -> memref<!tpu.dma_semaphore, #tpu.memory_space<semaphore_mem>>
    tpu.enqueue_dma source(%arg0 : memref<2x4x32xf32, #tpu.memory_space<any>>) target(%arg3 : memref<2x4x32xf32, #tpu.memory_space<any>>) target_semaphore(%1 : memref<!tpu.dma_semaphore, #tpu.memory_space<semaphore_mem>>)
    %c1_i32 = arith.constant 1 : i32
    %2 = tpu.memref_slice %arg6[%c1_i32] : memref<3x!tpu.dma_semaphore, #tpu.memory_space<semaphore_mem>> -> memref<1x!tpu.dma_semaphore, #tpu.memory_space<semaphore_mem>>
    %3 = tpu.memref_squeeze %2 : memref<1x!tpu.dma_semaphore, #tpu.memory_space<semaphore_mem>> -> memref<!tpu.dma_semaphore, #tpu.memory_space<semaphore_mem>>
    tpu.enqueue_dma source(%arg1 : memref<2x4x64xf32, #tpu.memory_space<any>>) target(%arg4 : memref<2x4x64xf32, #tpu.memory_space<any>>) target_semaphore(%3 : memref<!tpu.dma_semaphore, #tpu.memory_space<semaphore_mem>>)
    %c2_i32 = arith.constant 2 : i32
    %4 = tpu.memref_slice %arg6[%c2_i32] : memref<3x!tpu.dma_semaphore, #tpu.memory_space<semaphore_mem>> -> memref<1x!tpu.dma_semaphore, #tpu.memory_space<semaphore_mem>>
    %5 = tpu.memref_squeeze %4 : memref<1x!tpu.dma_semaphore, #tpu.memory_space<semaphore_mem>> -> memref<!tpu.dma_semaphore, #tpu.memory_space<semaphore_mem>>
    tpu.enqueue_dma source(%arg2 : memref<2x4x640xf32, #tpu.memory_space<any>>) target(%arg5 : memref<2x4x640xf32, #tpu.memory_space<any>>) target_semaphore(%5 : memref<!tpu.dma_semaphore, #tpu.memory_space<semaphore_mem>>)
    %c0_i32_0 = arith.constant 0 : i32
    %6 = tpu.memref_slice %arg6[%c0_i32_0] : memref<3x!tpu.dma_semaphore, #tpu.memory_space<semaphore_mem>> -> memref<1x!tpu.dma_semaphore, #tpu.memory_space<semaphore_mem>>
    %7 = tpu.memref_squeeze %6 : memref<1x!tpu.dma_semaphore, #tpu.memory_space<semaphore_mem>> -> memref<!tpu.dma_semaphore, #tpu.memory_space<semaphore_mem>>
    tpu.wait_dma2 semaphore(%7 : memref<!tpu.dma_semaphore, #tpu.memory_space<semaphore_mem>>) src(%arg0 : memref<2x4x32xf32, #tpu.memory_space<any>>) dst(%arg3 : memref<2x4x32xf32, #tpu.memory_space<any>>)
    %c1_i32_1 = arith.constant 1 : i32
    %8 = tpu.memref_slice %arg6[%c1_i32_1] : memref<3x!tpu.dma_semaphore, #tpu.memory_space<semaphore_mem>> -> memref<1x!tpu.dma_semaphore, #tpu.memory_space<semaphore_mem>>
    %9 = tpu.memref_squeeze %8 : memref<1x!tpu.dma_semaphore, #tpu.memory_space<semaphore_mem>> -> memref<!tpu.dma_semaphore, #tpu.memory_space<semaphore_mem>>
    tpu.wait_dma2 semaphore(%9 : memref<!tpu.dma_semaphore, #tpu.memory_space<semaphore_mem>>) src(%arg1 : memref<2x4x64xf32, #tpu.memory_space<any>>) dst(%arg4 : memref<2x4x64xf32, #tpu.memory_space<any>>)
    %c2_i32_2 = arith.constant 2 : i32
    %10 = tpu.memref_slice %arg6[%c2_i32_2] : memref<3x!tpu.dma_semaphore, #tpu.memory_space<semaphore_mem>> -> memref<1x!tpu.dma_semaphore, #tpu.memory_space<semaphore_mem>>
    %11 = tpu.memref_squeeze %10 : memref<1x!tpu.dma_semaphore, #tpu.memory_space<semaphore_mem>> -> memref<!tpu.dma_semaphore, #tpu.memory_space<semaphore_mem>>
    tpu.wait_dma2 semaphore(%11 : memref<!tpu.dma_semaphore, #tpu.memory_space<semaphore_mem>>) src(%arg2 : memref<2x4x640xf32, #tpu.memory_space<any>>) dst(%arg5 : memref<2x4x640xf32, #tpu.memory_space<any>>)
    return
  }
}

</mosaic_0001>

<bundles_post_ra>
// kernel: tpu_custom_call.1
= control target key start
LH: loop header
LB: loop body
LE: loop exit
PB: predicated region body
PF: predicated region fallthrough
CT: control target
= control target key end

     0   :  { %s99_s18 = smov [#allocation2]   ;;  %s100_s19 = smov [#allocation3]   ;;  %s154_s0 = inlined_call_operand.hbm [shape: f32[2,4,32], index: 0, kind: input, shape index: {}]   ;;  %s155_s3 = inlined_call_operand.hbm [shape: f32[2,4,32], index: 3, kind: output, shape index: {0}]   ;;  %s156_s1 = inlined_call_operand.hbm [shape: f32[2,4,64], index: 1, kind: input, shape index: {}]   ;;  %s157_s4 = inlined_call_operand.hbm [shape: f32[2,4,64], index: 4, kind: output, shape index: {1}]   ;;  %s158_s2 = inlined_call_operand.hbm [shape: f32[2,4,640], index: 2, kind: input, shape index: {}]   ;;  %s159_s5 = inlined_call_operand.hbm [shape: f32[2,4,640], index: 5, kind: output, shape index: {2}]  }
   0x1   :  { %s101_s20 = smov 0   ;;  %s102_s25 = smov [#allocation2 + $0x1]  }
   0x2   :  { %23 = dma.general %s154_s0, 128, %s155_s3, %s99_s18, %s100_s19, [#allocation4], %s101_s20, 0  }
   0x3   :  { %s103_s26 = smov [#allocation5]   ;;  %s104_s6 = smov [#allocation2 + $0x2]  }
   0x4   :  { %37 = dma.general %s156_s1, 128, %s157_s4, %s102_s25, %s103_s26, [#allocation6], %s101_s20, 0  }
   0x5   :  { %s105_s7 = smov [#allocation7]  }
   0x6   :  { %51 = dma.general %s158_s2, 640, %s159_s5, %s104_s6, %s105_s7, [#allocation8], %s101_s20, 0  }
   0x7   :  { %93 = dma.done.wait [#allocation2], 128 }
   0x8   :  { %94 = vsyncadd [#allocation2], 4294967168 }
   0x9   :  { %95 = dma.done.wait [#allocation2 + $0x1], 128 }
   0xa   :  { %96 = vsyncadd [#allocation2 + $0x1], 4294967168 }
   0xb   :  { %97 = dma.done.wait [#allocation2 + $0x2], 640 }
   0xc   :  { %98 = vsyncadd [#allocation2 + $0x2], 4294966656 }
   0xd   :  { %63 = vsyncmov [#allocation2] }
  0x10   :  { %s64_s0 = vpop.sfrf %63 }
  0x11   :  { %p83_p0 = scmp.ne.s32.totalorder %s64_s0, 0 }
  0x13   :  { %68 = shalt.err (%p83_p0)  }
  0x14   :  { %70 = vsyncmov [#allocation2 + $0x1] }
  0x17   :  { %s71_s1 = vpop.sfrf %70 }
  0x18   :  { %p84_p1 = scmp.ne.s32.totalorder %s71_s1, 0 }
  0x1a   :  { %75 = shalt.err (%p84_p1)  }
  0x1b   :  { %77 = vsyncmov [#allocation2 + $0x2] }
  0x1e   :  { %s78_s3 = vpop.sfrf %77 }
  0x1f   :  { %p85_p2 = scmp.ne.s32.totalorder %s78_s3, 0 }
  0x21   :  { %82 = shalt.err (%p85_p2)  }

</bundles_post_ra>
